<compile_context>
chip_gen: v5e
topology: v5e:2x2
jax: 0.10.0
libtpu: 0.0.40
codegen_flags: <defaults>
</compile_context>

<pallas_src>
import functools

import jax
import jax.numpy as jnp
from jax.experimental import pallas as pl
from jax.experimental.pallas import tpu as pltpu

HIDDEN = 24     # nn.Linear(state_size, 24) / nn.Linear(24, 24)
LANE = 128      # TPU lane width: hidden/output dims are zero-padded to this


def _round_up(n, m):
    return ((n + m - 1) // m) * m


def dqn_kernel(x_ref, w_ref, b_ref, o_ref, *, state_size, sp):
    """One batch tile: x (TB, state_size) -> o (TB, 128) bf16, 3 fused Linear layers."""
    bf16 = jnp.bfloat16
    x = x_ref[...].astype(bf16)

    # Static views into the packed parameter buffers (zero-padded to 128 lanes).
    # sp is a multiple of 16, so these slices sit on bf16 (16,128) tile boundaries.
    w1 = w_ref[0:state_size, :]                 # (state_size, 128), cols >= 24 are zero
    w2 = w_ref[sp:sp + LANE, :]                 # (128, 128), rows/cols >= 24 are zero
    w3 = w_ref[sp + LANE:sp + 2 * LANE, :]      # (128, 128), cols >= action_size are zero
    b1 = b_ref[0:1, :]
    b2 = b_ref[1:2, :]
    b3 = b_ref[2:3, :]

    # fc1 + ReLU (bf16 MXU operands, f32 accumulate, f32 epilogue)
    h1 = jnp.dot(x, w1, preferred_element_type=jnp.float32) + b1
    h1 = jnp.maximum(h1, 0.0)
    # fc2 + ReLU
    h2 = jnp.dot(h1.astype(bf16), w2, preferred_element_type=jnp.float32) + b2
    h2 = jnp.maximum(h2, 0.0)
    # fc3 (no activation); padded output lanes stay exactly zero
    out = jnp.dot(h2.astype(bf16), w3, preferred_element_type=jnp.float32) + b3
    o_ref[...] = out.astype(o_ref.dtype)        # bf16, full-lane (unmasked) store


def pack_params(params, state_size, action_size):
    """Pack w1,w2,w3 into one bf16 (SP+256, 128) buffer and b1,b2,b3 into one
    f32 (8, 128) buffer; everything zero-padded so padded lanes contribute 0.
    NOTE: if the raw params are updated, re-pack (padding must stay exactly zero)."""
    sp = _round_up(state_size, 16)              # bf16 sublane tile is (16, 128)
    w = jnp.zeros((sp + 2 * LANE, LANE), jnp.bfloat16)
    w = w.at[:state_size, :HIDDEN].set(params["w1"].astype(jnp.bfloat16))
    w = w.at[sp:sp + HIDDEN, :HIDDEN].set(params["w2"].astype(jnp.bfloat16))
    w = w.at[sp + LANE:sp + LANE + HIDDEN, :action_size].set(
        params["w3"].astype(jnp.bfloat16))
    b = jnp.zeros((8, LANE), jnp.float32)
    b = b.at[0, :HIDDEN].set(params["b1"].reshape(-1))
    b = b.at[1, :HIDDEN].set(params["b2"].reshape(-1))
    b = b.at[2, :action_size].set(params["b3"].reshape(-1))
    return w, b


def _choose_batch_tile(B, block_b):
    """Batch tile: multiple of 8, <= block_b, targeting >= 2 grid steps when
    there is more than one sublane-row of work, with minimal padding waste."""
    if B <= 8:
        return 8
    n_steps = max(2, pl.cdiv(B, block_b))
    return min(_round_up(pl.cdiv(B, n_steps), 8), _round_up(block_b, 8))


def dqn_forward(x, w_packed, b_packed, action_size, *, block_b=2048):
    """x: (B, state_size) f32.  Returns (B, action_size) f32 Q-values."""
    B, S = x.shape
    sp = w_packed.shape[0] - 2 * LANE        # row offset of w2 inside the packed buffer
    TB = _choose_batch_tile(B, block_b)
    Bp = _round_up(B, TB)
    x_p = jnp.pad(x, ((0, Bp - B), (0, 0))) if Bp != B else x

    out = pl.pallas_call(
        functools.partial(dqn_kernel, state_size=S, sp=sp),
        out_shape=jax.ShapeDtypeStruct((Bp, LANE), jnp.bfloat16),
        grid_spec=pltpu.PrefetchScalarGridSpec(
            num_scalar_prefetch=0,
            grid=(Bp // TB,),
            in_specs=[
                pl.BlockSpec((TB, S), lambda i: (i, 0)),            # batch tile (pipelined)
                pl.BlockSpec(w_packed.shape, lambda i: (0, 0)),     # weights: VMEM-resident
                pl.BlockSpec(b_packed.shape, lambda i: (0, 0)),     # biases: VMEM-resident
            ],
            out_specs=pl.BlockSpec((TB, LANE), lambda i: (i, 0)),   # lane-dense bf16 output
        ),
        compiler_params=pltpu.CompilerParams(
            # v7x: batch axis across both TensorCores (>=2 grid steps whenever B > 8)
            dimension_semantics=("parallel",),
        ),
    )(x_p, w_packed, b_packed)
    return out[:B, :action_size].astype(jnp.float32)


def init_params(key, state_size, action_size):
    """Deterministic init mimicking PyTorch Linear default U(-1/sqrt(fan_in), 1/sqrt(fan_in))."""
    ks = jax.random.split(key, 6)

    def linear(kw, kb, fan_in, fan_out):
        bound = 1.0 / jnp.sqrt(jnp.float32(fan_in))
        w = jax.random.uniform(kw, (fan_in, fan_out), jnp.float32, -bound, bound)
        b = jax.random.uniform(kb, (1, fan_out), jnp.float32, -bound, bound)
        return w, b

    w1, b1 = linear(ks[0], ks[1], state_size, HIDDEN)
    w2, b2 = linear(ks[2], ks[3], HIDDEN, HIDDEN)
    w3, b3 = linear(ks[4], ks[5], HIDDEN, action_size)
    return {"w1": w1, "b1": b1, "w2": w2, "b2": b2, "w3": w3, "b3": b3}


def dqn_reference_f32(x, p):
    h1 = jnp.maximum(x @ p["w1"] + p["b1"], 0.0)
    h2 = jnp.maximum(h1 @ p["w2"] + p["b2"], 0.0)
    return h2 @ p["w3"] + p["b3"]


def dqn_reference_mixed(x, p):
    """Same mixed-precision path as the kernel (bf16 operands, f32 accumulate)."""
    bf = jnp.bfloat16
    h1 = jnp.maximum(jnp.dot(x.astype(bf), p["w1"].astype(bf),
                             preferred_element_type=jnp.float32) + p["b1"], 0.0)
    h2 = jnp.maximum(jnp.dot(h1.astype(bf), p["w2"].astype(bf),
                             preferred_element_type=jnp.float32) + p["b2"], 0.0)
    return jnp.dot(h2.astype(bf), p["w3"].astype(bf),
                   preferred_element_type=jnp.float32) + p["b3"]


if __name__ == "__main__":
    key = jax.random.PRNGKey(0)
    k_param, k_x = jax.random.split(key)

    batch = 8
    state_size = 16
    action_size = 4

    params = init_params(k_param, state_size, action_size)
    w_packed, b_packed = pack_params(params, state_size, action_size)
    x = jax.random.normal(k_x, (batch, state_size), jnp.float32)

    out = dqn_forward(x, w_packed, b_packed, action_size)
    out = jax.block_until_ready(out)
    assert out.shape == (batch, action_size)

    # Same-path check (bf16-operand / f32-accumulate math; kernel output is bf16,
    # so allow bf16-output quantization error on top of the matched matmul path).
    ref_mixed = dqn_reference_mixed(x, params)
    assert jnp.allclose(out, ref_mixed, atol=2e-2, rtol=2e-2), "mismatch vs mixed-precision reference"

    # Semantic check against the pure-f32 PyTorch-equivalent forward.
    ref_f32 = dqn_reference_f32(x, params)
    assert jnp.allclose(out, ref_f32, atol=5e-2, rtol=5e-2), "mismatch vs f32 reference"

    print("KERNEL_OK")
</pallas_src>

<mosaic_0001>
module attributes {stable_mosaic.version = 11 : i64} {
  func.func @dqn_kernel(%arg0: i32, %arg1: memref<8x16xf32, #tpu.memory_space<vmem>>, %arg2: memref<272x128xbf16, #tpu.memory_space<vmem>>, %arg3: memref<8x128xf32, #tpu.memory_space<vmem>>, %arg4: memref<8x128xbf16, #tpu.memory_space<vmem>>) attributes {dimension_semantics = [#tpu.dimension_semantics<parallel>], iteration_bounds = array<i64: 1>, scalar_prefetch = 0 : i64, scratch_operands = 0 : i64, tpu.core_type = #tpu.core_type<tc>, window_params = [{transform_indices = @transform_0, window_bounds = array<i64: 8, 16>}, {pipeline_mode = #tpu.pipeline_mode<synchronous>, transform_indices = @transform_1, window_bounds = array<i64: 272, 128>}, {pipeline_mode = #tpu.pipeline_mode<synchronous>, transform_indices = @transform_2, window_bounds = array<i64: 8, 128>}, {transform_indices = @transform_3, window_bounds = array<i64: 8, 128>}]} {
    %c0 = arith.constant 0 : index
    %c0_0 = arith.constant 0 : index
    %0 = vector.load %arg1[%c0, %c0_0] : memref<8x16xf32, #tpu.memory_space<vmem>>, vector<8x16xf32>
    %1 = arith.truncf %0 : vector<8x16xf32> to vector<8x16xbf16>
    %c0_1 = arith.constant 0 : index
    %c0_2 = arith.constant 0 : index
    %2 = vector.load %arg2[%c0_1, %c0_2] : memref<272x128xbf16, #tpu.memory_space<vmem>>, vector<16x128xbf16>
    %c16 = arith.constant 16 : index
    %c0_3 = arith.constant 0 : index
    %3 = vector.load %arg2[%c16, %c0_3] : memref<272x128xbf16, #tpu.memory_space<vmem>>, vector<128x128xbf16>
    %c144 = arith.constant 144 : index
    %c0_4 = arith.constant 0 : index
    %4 = vector.load %arg2[%c144, %c0_4] : memref<272x128xbf16, #tpu.memory_space<vmem>>, vector<128x128xbf16>
    %c0_5 = arith.constant 0 : index
    %c0_6 = arith.constant 0 : index
    %5 = vector.load %arg3[%c0_5, %c0_6] : memref<8x128xf32, #tpu.memory_space<vmem>>, vector<1x128xf32>
    %c1 = arith.constant 1 : index
    %c0_7 = arith.constant 0 : index
    %6 = vector.load %arg3[%c1, %c0_7] : memref<8x128xf32, #tpu.memory_space<vmem>>, vector<1x128xf32>
    %c2 = arith.constant 2 : index
    %c0_8 = arith.constant 0 : index
    %7 = vector.load %arg3[%c2, %c0_8] : memref<8x128xf32, #tpu.memory_space<vmem>>, vector<1x128xf32>
    %cst = arith.constant dense<0.000000e+00> : vector<8x128xf32>
    %8 = tpu.matmul %1, %2, %cst {dimension_numbers = #tpu.dot_dimension_numbers<[1], [0], [0], [1], [0, 0, 1, 1], [], []>} : vector<8x16xbf16>, vector<16x128xbf16>, vector<8x128xf32> -> vector<8x128xf32>
    %9 = vector.broadcast %5 : vector<1x128xf32> to vector<8x128xf32>
    %10 = arith.addf %8, %9 : vector<8x128xf32>
    %cst_9 = arith.constant 0.000000e+00 : f32
    %11 = vector.broadcast %cst_9 : f32 to vector<8x128xf32>
    %12 = arith.maximumf %10, %11 : vector<8x128xf32>
    %13 = arith.truncf %12 : vector<8x128xf32> to vector<8x128xbf16>
    %cst_10 = arith.constant dense<0.000000e+00> : vector<8x128xf32>
    %14 = tpu.matmul %13, %3, %cst_10 {dimension_numbers = #tpu.dot_dimension_numbers<[1], [0], [0], [1], [0, 0, 1, 1], [], []>} : vector<8x128xbf16>, vector<128x128xbf16>, vector<8x128xf32> -> vector<8x128xf32>
    %15 = vector.broadcast %6 : vector<1x128xf32> to vector<8x128xf32>
    %16 = arith.addf %14, %15 : vector<8x128xf32>
    %cst_11 = arith.constant 0.000000e+00 : f32
    %17 = vector.broadcast %cst_11 : f32 to vector<8x128xf32>
    %18 = arith.maximumf %16, %17 : vector<8x128xf32>
    %19 = arith.truncf %18 : vector<8x128xf32> to vector<8x128xbf16>
    %cst_12 = arith.constant dense<0.000000e+00> : vector<8x128xf32>
    %20 = tpu.matmul %19, %4, %cst_12 {dimension_numbers = #tpu.dot_dimension_numbers<[1], [0], [0], [1], [0, 0, 1, 1], [], []>} : vector<8x128xbf16>, vector<128x128xbf16>, vector<8x128xf32> -> vector<8x128xf32>
    %21 = vector.broadcast %7 : vector<1x128xf32> to vector<8x128xf32>
    %22 = arith.addf %20, %21 : vector<8x128xf32>
    %23 = arith.truncf %22 : vector<8x128xf32> to vector<8x128xbf16>
    %c0_13 = arith.constant 0 : index
    %c0_14 = arith.constant 0 : index
    %24 = vector.load %arg4[%c0_13, %c0_14] : memref<8x128xbf16, #tpu.memory_space<vmem>>, vector<8x128xbf16>
    tpu.vector_store %arg4[%c0_13, %c0_14], %23 {strides = array<i32>} : memref<8x128xbf16, #tpu.memory_space<vmem>>, vector<8x128xbf16>,
    return
  }
  func.func @transform_0(%arg0: i32) -> (i32, i32) {
    %c0_i32 = arith.constant 0 : i32
    %c0_i32_0 = arith.constant 0 : i32
    return %arg0, %c0_i32 : i32, i32
  }
  func.func @transform_1(%arg0: i32) -> (i32, i32) {
    %c0_i32 = arith.constant 0 : i32
    %c0_i32_0 = arith.constant 0 : i32
    %c0_i32_1 = arith.constant 0 : i32
    return %c0_i32, %c0_i32_0 : i32, i32
  }
  func.func @transform_2(%arg0: i32) -> (i32, i32) {
    %c0_i32 = arith.constant 0 : i32
    %c0_i32_0 = arith.constant 0 : i32
    %c0_i32_1 = arith.constant 0 : i32
    return %c0_i32, %c0_i32_0 : i32, i32
  }
  func.func @transform_3(%arg0: i32) -> (i32, i32) {
    %c0_i32 = arith.constant 0 : i32
    %c0_i32_0 = arith.constant 0 : i32
    return %arg0, %c0_i32 : i32, i32
  }
}

</mosaic_0001>

<bundles_post_ra>
// kernel: tpu_custom_call.1
= control target key start
LH: loop header
LB: loop body
LE: loop exit
PB: predicated region body
PF: predicated region fallthrough
CT: control target
= control target key end

     0   :  { %8 = vsyncpa [#allocation3], 0  ;;  %s505_s0 = inlined_call_operand.hbm [shape: f32[8,16], index: 0, kind: input, shape index: {}]   ;;  %s506_s1 = inlined_call_operand.hbm [shape: bf16[272,128], index: 1, kind: input, shape index: {}]   ;;  %s507_s2 = inlined_call_operand.hbm [shape: f32[8,128], index: 2, kind: input, shape index: {}]   ;;  %s508_s3 = inlined_call_operand.hbm [shape: bf16[8,128], index: 3, kind: output, shape index: {}]  }
   0x1   :  { %9 = vsyncpa [#allocation6], 0  ;;  %s26_s14 = sshll.u32 %s506_s1, 4  ;;  %s27_s14 = int_to_ptr.hbm [resolvable:$true] %s26_s14 }
   0x2   :  { %10 = vsyncpa [#allocation4], 0  ;;  %s467_s15 = smov [#allocation5]   ;;  %s16_s19 = sshll.u32 %s505_s0, 4  ;;  %s17_s19 = int_to_ptr.hbm [resolvable:$true] %s16_s19 }
   0x3   :  { %s28_s16 = sshll.u32 %s467_s15, 4  ;;  %s468_s20 = smov 64   ;;  %s29_s16 = int_to_ptr.vmem [resolvable:$true] %s28_s16 }
   0x4   :  { %s469_s21 = smov 4   ;;  %s470_s22 = smov [#allocation2]  }
   0x5   :  { %34 = dma.hbm_to_vmem [thread:$0]  %s27_s14, 2176, %s29_s16, [#allocation6], %s468_s20, %s468_s20, %s469_s21  }
   0x6   :  { %s18_s23 = sshll.u32 %s470_s22, 4  ;;  %s40_s26 = sshll.u32 %s507_s2, 4  ;;  %s19_s23 = int_to_ptr.vmem [resolvable:$true] %s18_s23  ;;  %s41_s26 = int_to_ptr.hbm [resolvable:$true] %s40_s26 }
   0x7   :  { %21 = dma.hbm_to_vmem [thread:$0]  %s17_s19, 128, %s19_s23, [#allocation3]  }
   0x8   :  { %s471_s1 = smov [#allocation7]  }
   0x9   :  { %s42_s27 = sshll.u32 %s471_s1, 4  ;;  %s43_s27 = int_to_ptr.vmem [resolvable:$true] %s42_s27 }
   0xa   :  { %45 = dma.hbm_to_vmem [thread:$0]  %s41_s26, 128, %s43_s27, [#allocation6]  }
   0xb   :  { %461 = dma.done.wait [#allocation3], 128  }
   0xc   :  { %462 = vsyncadd [#allocation3], 4294967168 }
   0xd   :  { %463 = dma.done.wait [#allocation6], 2304  }
   0xe   :  { %464 = vsyncadd [#allocation6], 4294964992  ;;  %v339_v0 = vld [vmem:[#allocation5] sm:$0xff]  ;;  %v59_v1 = vld [vmem:[#allocation2] sm:$0xff]  ;;  %vm105_vm0 = vcmask 130048   ;;  %s472_s0 = smov [#allocation8]  }
   0xf   :  { %v347_v2 = vld [vmem:[#allocation5 + $0x40] sm:$0xff]  ;;  %v60_v3 = vpack.c.bf16 %v59_v1, %v59_v1  ;;  %116 = vmatpush.bf16.msra.mxu0 %v339_v0  ;;  %v346_v4 = vld [vmem:[#allocation5 + $0x38] sm:$0xff]  ;;  %v345_v5 = vld [vmem:[#allocation5 + $0x30] sm:$0xff]  ;;  %s257_s2 = sshll.u32 %s472_s0, 4  ;;  %s259_s30 = sshll.u32 %s508_s3, 4  ;;  %s258_s2 = int_to_ptr.vmem [resolvable:$true] %s257_s2  ;;  %s260_s30 = int_to_ptr.hbm [resolvable:$true] %s259_s30 }
  0x10   :  { %173 = vmatpush.bf16.msra.mxu1 %v347_v2  ;;  %v344_v6 = vld [vmem:[#allocation5 + $0x28] sm:$0xff]  ;;  %v343_v7 = vld [vmem:[#allocation5 + $0x20] sm:$0xff]  ;;  %v342_v8 = vld [vmem:[#allocation5 + $0x18] sm:$0xff] }
  0x11   :  { %v341_v9 = vld [vmem:[#allocation5 + $0x10] sm:$0xff]  ;;  %v340_v10 = vld [vmem:[#allocation5 + $0x8] sm:$0xff]  ;;  %v355_v11 = vld [vmem:[#allocation5 + $0x80] sm:$0xff] }
  0x12   :  { %274 = vmatmul.msk.bf16.vlgmr.msra.gmra.mxu0 %vm105_vm0, %v60_v3  ;;  %237 = vmatpush.bf16.msra.mxu2 %v355_v11  ;;  %v354_v12 = vld [vmem:[#allocation5 + $0x78] sm:$0xff]  ;;  %v353_v13 = vld [vmem:[#allocation5 + $0x70] sm:$0xff]  ;;  %v352_v14 = vld [vmem:[#allocation5 + $0x68] sm:$0xff] }
  0x13   :  { %v351_v15 = vld [vmem:[#allocation5 + $0x60] sm:$0xff]  ;;  %v350_v16 = vld [vmem:[#allocation5 + $0x58] sm:$0xff]  ;;  %v362_v17 = vld [vmem:[#allocation7] ss:$0 sm:$0xff] }
  0x14   :  { %174 = vmatpush.bf16.msra.mxu1 %v346_v4  ;;  %v349_v23 = vld [vmem:[#allocation5 + $0x50] sm:$0xff]  ;;  %v348_v24 = vld [vmem:[#allocation5 + $0x48] sm:$0xff] }
  0x15   :  { %v363_v25 = vld [vmem:[#allocation7 + $0x1] ss:$0 sm:$0xff]  ;;  %v364_v31 = vld [vmem:[#allocation7 + $0x2] ss:$0 sm:$0xff] }
  0x16   :  { %238 = vmatpush.bf16.msra.mxu2 %v354_v12 }
  0x18   :  { %175 = vmatpush.bf16.msra.mxu1 %v345_v5 }
  0x1a   :  { %239 = vmatpush.bf16.msra.mxu2 %v353_v13 }
  0x1c   :  { %176 = vmatpush.bf16.msra.mxu1 %v344_v6 }
  0x1e   :  { %240 = vmatpush.bf16.msra.mxu2 %v352_v14 }
  0x20   :  { %177 = vmatpush.bf16.msra.mxu1 %v343_v7 }
  0x22   :  { %241 = vmatpush.bf16.msra.mxu2 %v351_v15 }
  0x24   :  { %178 = vmatpush.bf16.msra.mxu1 %v342_v8 }
  0x26   :  { %242 = vmatpush.bf16.msra.mxu2 %v350_v16 }
  0x28   :  { %179 = vmatpush.bf16.msra.mxu1 %v341_v9 }
  0x2a   :  { %243 = vmatpush.bf16.msra.mxu2 %v349_v23 }
  0x2c   :  { %180 = vmatpush.bf16.msra.mxu1 %v340_v10 }
  0x2e   :  { %244 = vmatpush.bf16.msra.mxu2 %v348_v24 }
  0x8f   :  { %v118_v18 = vpop.f32.mrf.mxu0 }
  0x90   :  { %v119_v19 = vadd.f32 %v362_v17, %v118_v18 }
  0x92   :  { %v122_v20 = vmax.f32 %v119_v19, 0.0 }
  0x94   :  { %v123_v21 = vpack.c.bf16 %v122_v20, %v122_v20 }
  0x96   :  { %181 = vmatmul.bf16.vlgmr.msra.gmra.mxu1 %v123_v21 }
  0x97   :  { %v120_v22 = vpop.f32.mrf.mxu0 }
 0x113   :  { %v182_v26 = vpop.f32.mrf.mxu1 }
 0x114   :  { %v183_v27 = vadd.f32 %v363_v25, %v182_v26 }
 0x116   :  { %v186_v28 = vmax.f32 %v183_v27, 0.0 }
 0x118   :  { %v187_v29 = vpack.c.bf16 %v186_v28, %v186_v28 }
 0x11a   :  { %245 = vmatmul.bf16.vlgmr.msra.gmra.mxu2 %v187_v29 }
 0x11b   :  { %v184_v30 = vpop.f32.mrf.mxu1 }
 0x19d   :  { %v246_v32 = vpop.f32.mrf.mxu2 }
 0x19e   :  { %v247_v33 = vadd.f32 %v364_v31, %v246_v32 }
 0x1a0   :  { %v250_v34 = vpack.c.bf16 %v247_v33, %v247_v33 }
 0x1a2   :  { %251 = vst [vmem:[#allocation8] sm:$0xf] %v250_v34 }
 0x1a3   :  { %262 = dma.vmem_to_hbm [thread:$0]  %s258_s2, 64, %s260_s30, [#allocation4]  }
 0x1a5   :  { %v248_v35 = vpop.f32.mrf.mxu2 }
 0x1a6   :  { %465 = dma.done.wait [#allocation4], 64  }
 0x1a7   :  { %466 = vsyncadd [#allocation4], 4294967232 }
 0x1a8   :  { %267 = vsyncpa [#allocation3], 1 }
 0x1a9   :  { %268 = vsyncpa [#allocation6], 1 }
 0x1aa   :  { %269 = vsyncpa [#allocation4], 1 }

</bundles_post_ra>
